<compile_context>
chip_gen: v6e
topology: v6e:2x2x1
jax: 0.10.0
libtpu: 0.0.40
codegen_flags: <defaults>
</compile_context>

<pallas_src>
import functools
import math

import jax
import jax.numpy as jnp
from jax import lax
from jax.experimental import pallas as pl
from jax.experimental.pallas import tpu as pltpu


def _round_up(n, m):
    return ((n + m - 1) // m) * m


# ----------------------------------------------------------------------------
# Kernel 1: fused offset + mask convolution  ->  rows [py_k | px_k | mask_k]
# ----------------------------------------------------------------------------
def _offset_mask_kernel(cols_ref, base_ref, w_ref, b_ref, out_ref, *, K):
    # cols_ref: (1, C*K, TQ) bf16     base_ref: (3K, TQ) f32  (zeros in mask rows)
    # w_ref:    (3K, C*K)    bf16     b_ref:    (3K, 1)  f32
    # out_ref:  (1, 3K, TQ)  f32      rows tap-major: 3k+0=py, 3k+1=px, 3k+2=mask
    y = jnp.dot(w_ref[...], cols_ref[0], preferred_element_type=jnp.float32)
    y = y + b_ref[...]
    rows = lax.broadcasted_iota(jnp.int32, (3 * K, 1), 0)
    is_mask_row = (rows % 3) == 2
    # offset rows: add base sampling coordinate; mask rows: sigmoid (EUP).
    out_ref[0] = jnp.where(is_mask_row, jax.nn.sigmoid(y), y + base_ref[...])


# ----------------------------------------------------------------------------
# Kernel 2: modulated deformable convolution (hot path).
# Grid = (B, Q-tiles, K taps); the tap axis accumulates into a VMEM scratch.
# ----------------------------------------------------------------------------
def _mdcn_tap_kernel(x_ref, pqm_ref, hg_ref, wg_ref, w_ref, b_ref,
                     out_ref, acc_ref):
    # x_ref:   (1, C, HW)     bf16  (resident across q-tiles and taps)
    # pqm_ref: (1, 1, 3, TQ)  f32   rows [py | px | mask] for this tap
    # hg/wg:   (HW, 1)        f32   source-pixel row / col index
    # w_ref:   (1, Co, C)     bf16  this tap's slice of the main weight
    # b_ref:   (Co, 1)        f32
    # out_ref: (1, Co, TQ)    f32   acc_ref: (Co, TQ) f32 scratch
    k = pl.program_id(2)

    @pl.when(k == 0)
    def _():
        acc_ref[...] = jnp.zeros_like(acc_ref)

    tq = pqm_ref.shape[-1]
    pqm = pqm_ref[...].reshape(3, tq)
    py = pqm[0:1, :]                                   # (1, TQ)
    px = pqm[1:2, :]
    mk = pqm[2:3, :]

    hg = hg_ref[...]                                   # (HW, 1)
    wg = wg_ref[...]
    wy = jnp.maximum(0.0, 1.0 - jnp.abs(py - hg))      # (HW, TQ) f32
    wx = jnp.maximum(0.0, 1.0 - jnp.abs(px - wg))
    bil = (wy * wx).astype(jnp.bfloat16)               # bilinear gather matrix

    c = x_ref.shape[1]
    hw = x_ref.shape[2]
    x = x_ref[...].reshape(c, hw)                      # (C, HW) bf16
    samp = jnp.dot(x, bil, preferred_element_type=jnp.float32)   # (C, TQ) f32
    samp = (samp * mk).astype(jnp.bfloat16)            # modulated sample

    co = w_ref.shape[1]
    w = w_ref[...].reshape(co, c)                      # (Co, C) bf16
    acc_ref[...] += jnp.dot(w, samp, preferred_element_type=jnp.float32)

    @pl.when(k == pl.num_programs(2) - 1)
    def _():
        out_ref[0] = (acc_ref[...] + b_ref[...]).astype(out_ref.dtype)


# ----------------------------------------------------------------------------
# Forward wrapper
# ----------------------------------------------------------------------------
def mdcn_forward(x, weight, bias, w_off, b_off, w_msk, b_msk,
                 stride, padding, dilation):
    """x: NCHW f32.  weight: (Co, C, kh, kw).  w_off: (2K, C, kh, kw) with the
    mmcv interleaved (y0, x0, y1, x1, ...) channel layout.  Returns NCHW."""
    B, C, H, W = x.shape
    Co, _, kh, kw = weight.shape
    K = kh * kw
    Ho = (H + 2 * padding - (dilation * (kh - 1) + 1)) // stride + 1
    Wo = (W + 2 * padding - (dilation * (kw - 1) + 1)) // stride + 1
    Q, HW = Ho * Wo, H * W

    f32, bf16 = jnp.float32, jnp.bfloat16

    # ---- generation-aware tiling / VMEM limit -------------------------------
    try:
        vmem_cap = int(pltpu.get_tpu_info().vmem_capacity_bytes)
    except Exception:
        vmem_cap = 64 * 1024 * 1024        # conservative (v7x-sized) fallback
    vmem_limit = min(int(vmem_cap * 0.70), 100 * 1024 * 1024)
    budget = int(vmem_limit * 0.80)
    x_resident = 2 * (C * HW * 2)          # double-buffered bf16 image block
    tile_q = 128
    for cand in (512, 256, 128):
        # wy + wx (f32) + bil (bf16) temporaries + small per-tile buffers
        tmp = HW * cand * 10 + cand * (8 * Co + 4 * C * K + 512)
        if x_resident + tmp <= budget:
            tile_q = cand
            break
    tile_q = min(tile_q, _round_up(Q, 128))
    assert tile_q % 128 == 0
    QP = _round_up(Q, tile_q)
    n_qt = QP // tile_q

    # ---- im2col patches for the offset/mask conv (wrapper glue) -------------
    # TODO(synk): build these in-kernel from the resident x block to avoid the
    #             K-times-inflated HBM tensor (small vs. kernel-2 compute).
    xp = jnp.pad(x, ((0, 0), (0, 0), (padding, padding), (padding, padding)))
    patches = []
    for i in range(kh):
        for j in range(kw):
            patches.append(
                xp[:, :,
                   i * dilation: i * dilation + (Ho - 1) * stride + 1: stride,
                   j * dilation: j * dilation + (Wo - 1) * stride + 1: stride])
    cols = jnp.stack(patches, axis=2)                     # (B, C, K, Ho, Wo)
    cols = cols.reshape(B, C * K, Q)                      # row index = c*K + tap
    cols = jnp.pad(cols, ((0, 0), (0, 0), (0, QP - Q))).astype(bf16)

    # ---- fused offset+mask weight, tap-major rows [off_y_k, off_x_k, mask_k] -
    w_y, w_x = w_off[0::2], w_off[1::2]                   # de-interleave (K,C,kh,kw)
    w_fused = jnp.stack([w_y, w_x, w_msk], axis=1).reshape(3 * K, C * K).astype(bf16)
    b_fused = jnp.stack([b_off[0::2], b_off[1::2], b_msk],
                        axis=1).reshape(3 * K, 1).astype(f32)

    # ---- base sampling coordinates per (tap, q), int32 math -----------------
    qi = jnp.arange(Q, dtype=jnp.int32)
    oy, ox = qi // Wo, qi % Wo
    ti = jnp.arange(K, dtype=jnp.int32)
    di, dj = ti // kw, ti % kw
    base_y = (oy[None, :] * stride - padding + di[:, None] * dilation).astype(f32)
    base_x = (ox[None, :] * stride - padding + dj[:, None] * dilation).astype(f32)
    base = jnp.stack([base_y, base_x, jnp.zeros_like(base_y)], axis=1)
    base = base.reshape(3 * K, Q)                         # zeros in mask rows
    base = jnp.pad(base, ((0, 0), (0, QP - Q)))

    cp1 = pltpu.CompilerParams(
        dimension_semantics=("parallel", "parallel"),
        vmem_limit_bytes=vmem_limit)

    # ---- kernel 1: [py | px | mask], lane-dense ------------------------------
    pqm = pl.pallas_call(
        functools.partial(_offset_mask_kernel, K=K),
        out_shape=jax.ShapeDtypeStruct((B, 3 * K, QP), f32),
        grid=(B, n_qt),
        in_specs=[
            pl.BlockSpec((1, C * K, tile_q), lambda b, q: (b, 0, q)),
            pl.BlockSpec((3 * K, tile_q), lambda b, q: (0, q)),
            pl.BlockSpec((3 * K, C * K), lambda b, q: (0, 0)),
            pl.BlockSpec((3 * K, 1), lambda b, q: (0, 0)),
        ],
        out_specs=pl.BlockSpec((1, 3 * K, tile_q), lambda b, q: (b, 0, q)),
        compiler_params=cp1,
    )(cols, base, w_fused, b_fused)
    # free (metadata) reshape so kernel 2 can select one tap per grid step
    pqm = pqm.reshape(B, K, 3, QP)

    # ---- kernel 2: modulated deformable conv --------------------------------
    x_flat = x.reshape(B, C, HW).astype(bf16)             # raw NCHW, no transpose
    hw_idx = jnp.arange(HW, dtype=jnp.int32)
    hg = (hw_idx // W).astype(f32).reshape(HW, 1)
    wg = (hw_idx % W).astype(f32).reshape(HW, 1)
    w_taps = weight.reshape(Co, C, K).transpose(2, 0, 1).astype(bf16)   # (K, Co, C)
    bvec = bias.reshape(Co, 1).astype(f32)

    # On multi-core chips with B > 1, shard only the batch axis so the resident
    # (C, HW) image block is not duplicated across cores for the same batch.
    sem2 = (("parallel", "arbitrary", "arbitrary") if B > 1
            else ("parallel", "parallel", "arbitrary"))
    cp2 = pltpu.CompilerParams(dimension_semantics=sem2,
                               vmem_limit_bytes=vmem_limit)

    out = pl.pallas_call(
        _mdcn_tap_kernel,
        out_shape=jax.ShapeDtypeStruct((B, Co, QP), f32),
        grid=(B, n_qt, K),
        in_specs=[
            pl.BlockSpec((1, C, HW), lambda b, q, k: (b, 0, 0)),      # resident
            pl.BlockSpec((1, 1, 3, tile_q), lambda b, q, k: (b, k, 0, q)),
            pl.BlockSpec((HW, 1), lambda b, q, k: (0, 0)),
            pl.BlockSpec((HW, 1), lambda b, q, k: (0, 0)),
            pl.BlockSpec((1, Co, C), lambda b, q, k: (k, 0, 0)),
            pl.BlockSpec((Co, 1), lambda b, q, k: (0, 0)),
        ],
        out_specs=pl.BlockSpec((1, Co, tile_q), lambda b, q, k: (b, 0, q)),
        scratch_shapes=[pltpu.VMEM((Co, tile_q), jnp.float32)],
        compiler_params=cp2,
    )(x_flat, pqm, hg, wg, w_taps, bvec)

    # NCHW directly: just slice off the Q padding and reshape (no transpose).
    return out[:, :, :Q].reshape(B, Co, Ho, Wo)


# ----------------------------------------------------------------------------
# Module: ModulatedDeformConv2dPack (forward only), matching init_weights()
# ----------------------------------------------------------------------------
class ModulatedDeformConv2dPackPallas:
    def __init__(self, in_channels, out_channels, kernel_size, stride=1,
                 padding=0, dilation=1, groups=1, deform_groups=1, bias=True,
                 key=None):
        assert groups == 1 and deform_groups == 1  # TODO(synk): grouped variants
        self.in_channels, self.out_channels = in_channels, out_channels
        self.kh = self.kw = kernel_size
        self.stride, self.padding, self.dilation = stride, padding, dilation
        K = self.kh * self.kw

        key = jax.random.PRNGKey(0) if key is None else key
        # init_weights(): main weight ~ U(-stdv, stdv); bias and the
        # conv_offset / conv_mask weights & biases are zero-initialized,
        # exactly as in the PyTorch module.
        n = in_channels * self.kh * self.kw
        stdv = 1.0 / math.sqrt(n)
        self.weight = jax.random.uniform(
            key, (out_channels, in_channels, self.kh, self.kw), jnp.float32,
            -stdv, stdv)
        self.bias = jnp.zeros((out_channels,), jnp.float32)
        self.w_off = jnp.zeros((2 * K, in_channels, self.kh, self.kw), jnp.float32)
        self.b_off = jnp.zeros((2 * K,), jnp.float32)
        self.w_msk = jnp.zeros((K, in_channels, self.kh, self.kw), jnp.float32)
        self.b_msk = jnp.zeros((K,), jnp.float32)

    def __call__(self, x):
        return mdcn_forward(x, self.weight, self.bias, self.w_off, self.b_off,
                            self.w_msk, self.b_msk,
                            self.stride, self.padding, self.dilation)


# ----------------------------------------------------------------------------
# Pure-JAX reference (for correctness check)
# ----------------------------------------------------------------------------
def _ref_plain_conv(x, w, b, stride, pad, dil):
    out = lax.conv_general_dilated(
        x, w, window_strides=(stride, stride), padding=[(pad, pad), (pad, pad)],
        rhs_dilation=(dil, dil), dimension_numbers=('NCHW', 'OIHW', 'NCHW'),
        precision=lax.Precision.HIGHEST)
    return out + b[None, :, None, None]


def _ref_mdconv(x, offset, mask, w, b, stride, pad, dil):
    B, C, H, W = x.shape
    Co, _, kh, kw = w.shape
    K = kh * kw
    Ho = (H + 2 * pad - (dil * (kh - 1) + 1)) // stride + 1
    Wo = (W + 2 * pad - (dil * (kw - 1) + 1)) // stride + 1
    Q = Ho * Wo
    off_y = offset[:, 0::2].reshape(B, K, Q)
    off_x = offset[:, 1::2].reshape(B, K, Q)
    m = mask.reshape(B, K, Q)
    ki, kj = jnp.arange(K) // kw, jnp.arange(K) % kw
    qy, qx = jnp.arange(Q) // Wo, jnp.arange(Q) % Wo
    base_y = (qy[None, :] * stride - pad + ki[:, None] * dil).astype(jnp.float32)
    base_x = (qx[None, :] * stride - pad + kj[:, None] * dil).astype(jnp.float32)
    py = base_y[None] + off_y
    px = base_x[None] + off_x
    hg = jnp.arange(H, dtype=jnp.float32)
    wg = jnp.arange(W, dtype=jnp.float32)
    wy = jnp.maximum(0.0, 1.0 - jnp.abs(py[..., None] - hg))     # [B,K,Q,H]
    wx = jnp.maximum(0.0, 1.0 - jnp.abs(px[..., None] - wg))     # [B,K,Q,W]
    samp = jnp.einsum('bkqh,bkqw,bchw->bkqc', wy, wx, x,
                      precision=lax.Precision.HIGHEST)
    samp = samp * m[..., None]
    out = jnp.einsum('bkqc,ock->boq', samp, w.reshape(Co, C, K),
                     precision=lax.Precision.HIGHEST) + b[None, :, None]
    return out.reshape(B, Co, Ho, Wo)


if __name__ == "__main__":
    B, Cin, H, W = 2, 4, 16, 16
    Cout, ksz, stride, pad, dil = 8, 3, 1, 1, 1
    K = ksz * ksz

    key = jax.random.PRNGKey(0)
    kx, kwgt, k1, k2, k3, k4 = jax.random.split(key, 6)
    x = jax.random.normal(kx, (B, Cin, H, W), jnp.float32)

    model = ModulatedDeformConv2dPackPallas(Cin, Cout, ksz, stride, pad, dil,
                                            groups=1, deform_groups=1, bias=True,
                                            key=kwgt)
    # Test-only perturbation: the spec zero-inits conv_offset/conv_mask, which
    # makes the deformable path degenerate (offset=0, mask=0.5).  Overwrite the
    # parameters with small deterministic values so the bilinear sampling path
    # is exercised; the forward-pass math is unchanged.
    model.w_off = 0.05 * jax.random.normal(k1, (2 * K, Cin, ksz, ksz), jnp.float32)
    model.b_off = 0.02 * jax.random.normal(k2, (2 * K,), jnp.float32)
    model.w_msk = 0.05 * jax.random.normal(k3, (K, Cin, ksz, ksz), jnp.float32)
    model.b_msk = 0.02 * jax.random.normal(k4, (K,), jnp.float32)

    out = jax.block_until_ready(model(x))
    assert out.shape == (B, Cout, H, W), out.shape

    # correctness check against a pure-JAX f32 reference (kernels use bf16 MXU
    # operands with f32 accumulation, hence the tolerance)
    off_ref = _ref_plain_conv(x, model.w_off, model.b_off, stride, pad, dil)
    msk_ref = jax.nn.sigmoid(_ref_plain_conv(x, model.w_msk, model.b_msk,
                                             stride, pad, dil))
    ref = _ref_mdconv(x, off_ref, msk_ref, model.weight, model.bias,
                      stride, pad, dil)
    max_err = float(jnp.max(jnp.abs(out - ref)))
    assert max_err < 8e-2, f"max abs error {max_err}"

    print("KERNEL_OK")
</pallas_src>

<mosaic_0001>
module attributes {stable_mosaic.version = 11 : i64} {
  func.func @_offset_mask_kernel(%arg0: i32, %arg1: i32, %arg2: memref<1x36x256xbf16, #tpu.memory_space<vmem>>, %arg3: memref<27x256xf32, #tpu.memory_space<vmem>>, %arg4: memref<27x36xbf16, #tpu.memory_space<vmem>>, %arg5: memref<27x1xf32, #tpu.memory_space<vmem>>, %arg6: memref<1x27x256xf32, #tpu.memory_space<vmem>>) attributes {dimension_semantics = [#tpu.dimension_semantics<parallel>, #tpu.dimension_semantics<parallel>], iteration_bounds = array<i64: 2, 1>, scalar_prefetch = 0 : i64, scratch_operands = 0 : i64, tpu.core_type = #tpu.core_type<tc>, window_params = [{transform_indices = @transform_0, window_bounds = array<i64: 1, 36, 256>}, {transform_indices = @transform_1, window_bounds = array<i64: 27, 256>}, {pipeline_mode = #tpu.pipeline_mode<synchronous>, transform_indices = @transform_2, window_bounds = array<i64: 27, 36>}, {pipeline_mode = #tpu.pipeline_mode<synchronous>, transform_indices = @transform_3, window_bounds = array<i64: 27, 1>}, {transform_indices = @transform_4, window_bounds = array<i64: 1, 27, 256>}]} {
    %c0 = arith.constant 0 : index
    %c0_0 = arith.constant 0 : index
    %0 = vector.load %arg4[%c0, %c0_0] : memref<27x36xbf16, #tpu.memory_space<vmem>>, vector<27x36xbf16>
    %c0_1 = arith.constant 0 : index
    %c0_2 = arith.constant 0 : index
    %c0_3 = arith.constant 0 : index
    %1 = vector.load %arg2[%c0_1, %c0_2, %c0_3] : memref<1x36x256xbf16, #tpu.memory_space<vmem>>, vector<1x36x256xbf16>
    %2 = vector.shape_cast %1 : vector<1x36x256xbf16> to vector<36x256xbf16>
    %cst = arith.constant dense<0.000000e+00> : vector<27x256xf32>
    %3 = tpu.matmul %0, %2, %cst {dimension_numbers = #tpu.dot_dimension_numbers<[1], [0], [0], [1], [0, 0, 1, 1], [], []>} : vector<27x36xbf16>, vector<36x256xbf16>, vector<27x256xf32> -> vector<27x256xf32>
    %c0_4 = arith.constant 0 : index
    %c0_5 = arith.constant 0 : index
    %4 = vector.load %arg5[%c0_4, %c0_5] : memref<27x1xf32, #tpu.memory_space<vmem>>, vector<27x1xf32>
    %5 = vector.broadcast %4 : vector<27x1xf32> to vector<27x256xf32>
    %6 = arith.addf %3, %5 : vector<27x256xf32>
    %7 = tpu.iota {dimensions = array<i32: 0>} : vector<27x1xi32>
    %c3_i32 = arith.constant 3 : i32
    %c0_i32 = arith.constant 0 : i32
    %8 = arith.cmpi eq, %c3_i32, %c0_i32 : i32
    %c1_i32 = arith.constant 1 : i32
    %9 = arith.select %8, %c1_i32, %c3_i32 : i32
    %10 = vector.broadcast %9 : i32 to vector<27x1xi32>
    %11 = arith.remsi %7, %10 : vector<27x1xi32>
    %c0_i32_6 = arith.constant 0 : i32
    %12 = vector.broadcast %c0_i32_6 : i32 to vector<27x1xi32>
    %13 = arith.cmpi ne, %11, %12 : vector<27x1xi32>
    %c0_i32_7 = arith.constant 0 : i32
    %14 = vector.broadcast %c0_i32_7 : i32 to vector<27x1xi32>
    %15 = arith.cmpi slt, %11, %14 : vector<27x1xi32>
    %c0_i32_8 = arith.constant 0 : i32
    %16 = arith.cmpi slt, %9, %c0_i32_8 : i32
    %17 = vector.broadcast %16 : i1 to vector<27x1xi1>
    %18 = vector.broadcast %17 : vector<27x1xi1> to vector<27x1xi1>
    %19 = arith.xori %15, %18 : vector<27x1xi1>
    %20 = arith.andi %19, %13 : vector<27x1xi1>
    %21 = vector.broadcast %9 : i32 to vector<27x1xi32>
    %22 = arith.addi %11, %21 : vector<27x1xi32>
    %23 = arith.select %20, %22, %11 : vector<27x1xi1>, vector<27x1xi32>
    %c2_i32 = arith.constant 2 : i32
    %24 = vector.broadcast %c2_i32 : i32 to vector<27x1xi32>
    %25 = arith.cmpi eq, %23, %24 : vector<27x1xi32>
    %26 = arith.negf %6 : vector<27x256xf32>
    %27 = math.exp %26 : vector<27x256xf32>
    %cst_9 = arith.constant 1.000000e+00 : f32
    %28 = vector.broadcast %cst_9 : f32 to vector<27x256xf32>
    %29 = arith.addf %28, %27 : vector<27x256xf32>
    %30 = arith.divf %28, %29 : vector<27x256xf32>
    %c0_10 = arith.constant 0 : index
    %c0_11 = arith.constant 0 : index
    %31 = vector.load %arg3[%c0_10, %c0_11] : memref<27x256xf32, #tpu.memory_space<vmem>>, vector<27x256xf32>
    %32 = arith.addf %6, %31 : vector<27x256xf32>
    %33 = vector.shape_cast %25 : vector<27x1xi1> to vector<27x1xi1>
    %34 = vector.broadcast %33 : vector<27x1xi1> to vector<27x256xi1>
    %35 = arith.select %34, %30, %32 : vector<27x256xi1>, vector<27x256xf32>
    %c0_12 = arith.constant 0 : index
    %c0_13 = arith.constant 0 : index
    %c0_14 = arith.constant 0 : index
    %36 = vector.load %arg6[%c0_12, %c0_13, %c0_14] : memref<1x27x256xf32, #tpu.memory_space<vmem>>, vector<1x27x256xf32>
    %37 = vector.shape_cast %36 : vector<1x27x256xf32> to vector<27x256xf32>
    %38 = vector.shape_cast %35 : vector<27x256xf32> to vector<1x27x256xf32>
    tpu.vector_store %arg6[%c0_12, %c0_13, %c0_14], %38 {strides = array<i32>} : memref<1x27x256xf32, #tpu.memory_space<vmem>>, vector<1x27x256xf32>,
    return
  }
  func.func @transform_0(%arg0: i32, %arg1: i32) -> (i32, i32, i32) {
    %c0_i32 = arith.constant 0 : i32
    %c0_i32_0 = arith.constant 0 : i32
    return %arg0, %c0_i32, %arg1 : i32, i32, i32
  }
  func.func @transform_1(%arg0: i32, %arg1: i32) -> (i32, i32) {
    %c0_i32 = arith.constant 0 : i32
    %c0_i32_0 = arith.constant 0 : i32
    return %c0_i32, %arg1 : i32, i32
  }
  func.func @transform_2(%arg0: i32, %arg1: i32) -> (i32, i32) {
    %c0_i32 = arith.constant 0 : i32
    %c0_i32_0 = arith.constant 0 : i32
    %c0_i32_1 = arith.constant 0 : i32
    return %c0_i32, %c0_i32_0 : i32, i32
  }
  func.func @transform_3(%arg0: i32, %arg1: i32) -> (i32, i32) {
    %c0_i32 = arith.constant 0 : i32
    %c0_i32_0 = arith.constant 0 : i32
    %c0_i32_1 = arith.constant 0 : i32
    return %c0_i32, %c0_i32_0 : i32, i32
  }
  func.func @transform_4(%arg0: i32, %arg1: i32) -> (i32, i32, i32) {
    %c0_i32 = arith.constant 0 : i32
    %c0_i32_0 = arith.constant 0 : i32
    return %arg0, %c0_i32, %arg1 : i32, i32, i32
  }
}

</mosaic_0001>

<bundles_post_ra>
// kernel: tpu_custom_call.1
= control target key start
LH: loop header
LB: loop body
LE: loop exit
PB: predicated region body
PF: predicated region fallthrough
CT: control target
= control target key end

     0   :  { %s823_s15 = smov 0   ;;  %s825_s16 = smov 0   ;;  %s1018_s0 = inlined_call_operand.vmem [shape: bf16[2,36,256], index: 0, kind: input, shape index: {}]   ;;  %s1019_s1 = inlined_call_operand.vmem [shape: f32[27,256], index: 1, kind: input, shape index: {}]   ;;  %s1020_s2 = inlined_call_operand.vmem [shape: bf16[27,36], index: 2, kind: input, shape index: {}]   ;;  %s1021_s3 = inlined_call_operand.vmem [shape: f32[27,1], index: 3, kind: input, shape index: {}]   ;;  %s1022_s4 = inlined_call_operand.vmem [shape: f32[2,27,256], index: 4, kind: output, shape index: {}]  }
   0x1   :  { %s827_s17 = smov 0  }
   0x2 LB: > { %s26_s18 = sadd.s32 1, %s791_s16  ;;  %p663_p0 = scmp.ge.s32.totalorder %s795_s17, 1  ;;  %s795_s17 = sphi %s827_s17, %s14_s17   ;;  %s791_s16 = sphi %s825_s16, %s1040_s16   ;;  %s787_s15 = sphi %s823_s15, %s1039_s15  }
   0x3   : > { %p28_p1 = scmp.ge.s32.totalorder %s26_s18, 2  ;;  %p194_p2 = scmp.lt.s32.totalorder %s795_s17, 3 }
   0x5   : > { %s1042_s18 = smov (%p28_p1, %s26_s18), 0  ;;  %p195_p3 = pnand %p663_p0, %p194_p2 }
   0x6   : > { %p234_p4 = scmp.lt.s32.totalorder (!%p195_p3), %s787_s15, 1 }
   0x7   : > { %198 = sbr.rel (%p195_p3) target bundleno = 268 (0x10c), region = 36 }
   0xc   : > { %v797_v0 = vmov 0   ;;  %v271_v1 = vld [vmem:[%s1021_s3 + $0x10] sm:$0xff]  ;;  %s1044_s15 = smov (!%p234_p4, %s787_s15), 1  ;;  %v269_v2 = vld [vmem:[%s1021_s3] sm:$0xff]  ;;  %v272_v3 = vld [vmem:[%s1021_s3 + $0x18] sm:$0x7]  ;;  %v395_v15 = vlaneseq }
   0xd   : > { %374 = vmatprep.mubr.bf16.mxu0 %v797_v0  ;;  %384 = vmatprep.mubr.bf16.mxu1 %v797_v0  ;;  %s695_s23 = smul.u32 40, %s1044_s15  ;;  %v270_v4 = vld [vmem:[%s1021_s3 + $0x8] sm:$0xff]  ;;  %vm335_vm0 = vcmask 1041408   ;;  %v739_v13 = vld [vmem:[%s1020_s2] sm:$0xff]   ;;  %vm328_vm1 = vcmask 293888   ;;  %s688_s9 = sshll.u32 %s1044_s15, 6 }
   0xe   : > { %730 = vset.pattern.permute.xlu1 %v797_v0  ;;  %729 = vset.pattern.permute.xlu0 %v797_v0  ;;  %v740_v14 = vld [vmem:[%s1020_s2 + $0x8] sm:$0x3f]   ;;  %v396_v16 = vshrl.u32 %v395_v15, 7  ;;  %s941_s19 = scalar_lea.vmem %s1022_s4, %s688_s9 }
   0xf   : > { %285 = vperm.xlu1 %730, %v271_v1   ;;  %275 = vperm.xlu0 %729, %v269_v2   ;;  %s241_s30 = scalar_lea.vmem %s1018_s0, %s695_s23 }
  0x10   : > { %v268_v5 = vld [vmem:[%s241_s30 + $0x20] sm:$0x33]  ;;  %v733_v8 = vld [vmem:[%s241_s30 + $0x14] ss:$8 sps:$4 sm:$0xff]   ;;  %v735_v10 = vld [vmem:[%s241_s30 + $0x10] ss:$8 sps:$4 sm:$0xff]  }
  0x11   : > { %v674_v6 = vcombine.high %v268_v5, %v268_v5  ;;  %v673_v7 = vcombine.low %v268_v5, %v268_v5  ;;  %v736_v11 = vld [vmem:[%s241_s30 + $0x4] ss:$8 sps:$4 sm:$0xff]   ;;  %v738_v12 = vld [vmem:[%s241_s30] ss:$8 sps:$4 sm:$0xff]   ;;  %v398_v19 = vadd.s32 16, %v396_v16  ;;  %v397_v34 = vadd.s32 8, %v396_v16 }
  0x12   : > { %v869_v24 = vmul.u32.u64.low 2863311531, %v396_v16  ;;  %v870_v25 = vmul.u32.u64.high 2863311531, %v396_v16, %v869_v24  ;;  %v399_v41 = vadd.s32 24, %v396_v16 }
  0x13   : > { %290 = vperm.xlu1 %730, %v272_v3   ;;  %280 = vperm.xlu0 %729, %v270_v4   ;;  %v337_v9 = vsel %vm335_vm0, %v673_v7, 0  ;;  %v872_v26 = vmul.u32.u64.low 2863311531, %v398_v19  ;;  %v873_v27 = vmul.u32.u64.high 2863311531, %v398_v19, %v872_v26 }
  0x14   : > { %675 = vmatprep.subr.msk.bf16.mxu0 %vm335_vm0, %v674_v6  ;;  %689 = vmatprep.subr.msk.bf16.mxu1 %vm335_vm0, %v674_v6  ;;  %v887_v46 = vmul.u32.u64.low 2863311531, %v397_v34  ;;  %v888_v47 = vmul.u32.u64.high 2863311531, %v397_v34, %v887_v46  ;;  %v896_v52 = vmul.u32.u64.low 2863311531, %v399_v41  ;;  %v897_v53 = vmul.u32.u64.high 2863311531, %v399_v41, %v896_v52 }
  0x15   : > { %353 = vmatpush1.bf16.msra.mxu0 %v337_v9  ;;  %692 = vmatpush1.bf16.msra.mxu1 %v337_v9  ;;  %v406_v56 = vshrl.u32 %v870_v25, 1  ;;  %v428_v57 = vshrl.u32 %v873_v27, 1  ;;  %v516_v27 = vld [vmem:[%s1019_s1] sm:$0xff]  ;;  %v522_v52 = vld [vmem:[%s1019_s1 + $0x30] sm:$0x7] }
  0x16   : > { %354 = vmatprep.subr.bf16.mxu0 %v733_v8  ;;  %690 = vmatprep.subr.bf16.mxu1 %v733_v8  ;;  %v417_v60 = vshrl.u32 %v888_v47, 1  ;;  %v439_v61 = vshrl.u32 %v897_v53, 1  ;;  %v518_v47 = vld [vmem:[%s1019_s1 + $0x10] sm:$0xff] }
  0x17   : > { %v407_v58 = vmul.u32 3, %v406_v56  ;;  %v429_v59 = vmul.u32 3, %v428_v57  ;;  %v519_v56 = vld [vmem:[%s1019_s1 + $0x18] sm:$0xff] }
  0x18   : > { %v418_v4 = vmul.u32 3, %v417_v60  ;;  %v440_v6 = vmul.u32 3, %v439_v61 }
  0x19   : > { %355 = vmatpush1.bf16.msra.mxu0 %v735_v10  ;;  %693 = vmatpush1.bf16.msra.mxu1 %v735_v10  ;;  %v408_v0 = vsub.s32 %v396_v16, %v407_v58  ;;  %v430_v2 = vsub.s32 %v398_v19, %v429_v59 }
  0x1a   : > { %356 = vmatprep.subr.bf16.mxu0 %v736_v11  ;;  %691 = vmatprep.subr.bf16.mxu1 %v736_v11  ;;  %v441_v16 = vsub.s32 %v399_v41, %v440_v6  ;;  %v517_v41 = vld [vmem:[%s1019_s1 + $0x8] sm:$0xff] }
  0x1b   : > { %vm444_vm2 = vcmp.ne.s32.totalorder %v408_v0, 0  ;;  %vm448_vm3 = vcmp.lt.s32.totalorder %v408_v0, 0  ;;  %vm446_vm4 = vcmp.ne.s32.totalorder %v430_v2, 0  ;;  %vm450_vm5 = vcmp.lt.s32.totalorder %v430_v2, 0 }
  0x1c   : > { %v456_v15 = vadd.s32 3, %v408_v0  ;;  %vm906_vm6 = vmand %vm448_vm3, %vm444_vm2  ;;  %vm447_vm10 = vcmp.ne.s32.totalorder %v441_v16, 0  ;;  %vm451_vm11 = vcmp.lt.s32.totalorder %v441_v16, 0 }
  0x1d   : > { %357 = vmatpush1.bf16.msra.mxu0 %v738_v12  ;;  %694 = vmatpush1.bf16.msra.mxu1 %v738_v12  ;;  %v419_v12 = vsub.s32 %v397_v34, %v418_v4  ;;  %vm911_vm7 = vmand %vm450_vm5, %vm446_vm4 }
  0x1e   : > { %v460_v26 = vsel %vm906_vm6, %v456_v15, %v408_v0  ;;  %vm934_vm14 = vmand %vm451_vm11, %vm447_vm10 }
  0x1f   : > { %vm445_vm8 = vcmp.ne.s32.totalorder %v419_v12, 0  ;;  %vm449_vm9 = vcmp.lt.s32.totalorder %v419_v12, 0  ;;  %vm930_vm13 = vcmp.eq.s32.totalorder %v460_v26, 2 }
  0x20   : > { %676 = vmatmul.mubr.msk.bf16.vlgmr.msra.gmra.mxu0 %vm328_vm1, %v739_v13  ;;  %677 = vmatmul.mubr.msk.bf16.vlgmr.msra.gmra.mxu1 %vm328_vm1, %v740_v14  ;;  %vm926_vm12 = vmand %vm449_vm9, %vm445_vm8 }
  0x8a   : > { %v286_v17 = vpop.permute.xlu1 %285  ;;  %v276_v18 = vpop.permute.xlu0 %275 }
  0x8e   : > { %v291_v32 = vpop.permute.xlu1 %290  ;;  %v281_v33 = vpop.permute.xlu0 %280 }
  0xe0   : > { %v376_v20 = vpop.f32.mrf.mxu0  ;;  %v386_v21 = vpop.f32.mrf.mxu1 }
  0xe1   : > { %v865_v22 = vadd.f32 %v376_v20, %v276_v18  ;;  %v867_v23 = vadd.f32 %v386_v21, %v286_v17  ;;  %v458_v20 = vadd.s32 3, %v430_v2 }
  0xe2   : > { %v378_v28 = vpop.f32.mrf.mxu0  ;;  %v388_v29 = vpop.f32.mrf.mxu1 }
  0xe3   : > { %v678_v30 = vmul.f32 -1.442695, %v865_v22  ;;  %v682_v31 = vmul.f32 -1.442695, %v867_v23  ;;  %v877_v35 = vadd.f32 %v378_v28, %v276_v18  ;;  %v879_v36 = vadd.f32 %v388_v29, %v286_v17 }
  0xe4   : > { %v380_v37 = vpop.f32.mrf.mxu0  ;;  %v390_v38 = vpop.f32.mrf.mxu1  ;;  %v462_v28 = vsel %vm911_vm7, %v458_v20, %v430_v2  ;;  %v457_v29 = vadd.s32 3, %v419_v12 }
  0xe5   : > { %741 = vpow2.f32 %v678_v30  ;;  %v881_v39 = vadd.f32 %v380_v37, %v281_v33  ;;  %v883_v40 = vadd.f32 %v390_v38, %v291_v32  ;;  %v679_v42 = vmul.f32 -1.442695, %v877_v35  ;;  %v520_v30 = vld [vmem:[%s1019_s1 + $0x20] sm:$0xff] }
  0xe6   : > { %743 = vpow2.f32 %v682_v31  ;;  %v683_v43 = vmul.f32 -1.442695, %v879_v36  ;;  %v382_v44 = vpop.f32.mrf.mxu0  ;;  %v392_v45 = vpop.f32.mrf.mxu1  ;;  %v524_v37 = vadd.f32 %v516_v27, %v865_v22  ;;  %vm944_vm15 = vcmp.eq.s32.totalorder %v462_v28, 2 }
  0xe7   : > { %v680_v48 = vmul.f32 -1.442695, %v881_v39  ;;  %v684_v49 = vmul.f32 -1.442695, %v883_v40  ;;  %745 = vpow2.f32 %v679_v42  ;;  %v892_v50 = vadd.f32 %v382_v44, %v281_v33  ;;  %v521_v44 = vld [vmem:[%s1019_s1 + $0x28] sm:$0xff] }
  0xe8   : > { %v894_v51 = vadd.f32 %v392_v45, %v291_v32  ;;  %747 = vpow2.f32 %v683_v43  ;;  %v459_v32 = vadd.s32 3, %v441_v16  ;;  %v528_v43 = vadd.f32 %v520_v30, %v867_v23 }
  0xe9   : > { %749 = vpow2.f32 %v680_v48  ;;  %v681_v54 = vmul.f32 -1.442695, %v892_v50  ;;  %v461_v45 = vsel %vm926_vm12, %v457_v29, %v419_v12  ;;  %v526_v58 = vadd.f32 %v518_v47, %v881_v39 }
  0xea   : > { %v685_v55 = vmul.f32 -1.442695, %v894_v51  ;;  %751 = vpow2.f32 %v684_v49  ;;  %v463_v48 = vsel %vm934_vm14, %v459_v32, %v441_v16  ;;  %v525_v49 = vadd.f32 %v517_v41, %v877_v35 }
  0xeb   : > { %753 = vpow2.f32 %v681_v54  ;;  %v529_v54 = vadd.f32 %v521_v44, %v879_v36  ;;  %vm973_vm0 = vcmp.eq.s32.totalorder %v461_v45, 2  ;;  %vm983_vm1 = vcmp.eq.s32.totalorder %v463_v48, 2  ;;  %v523_v36 = vld [vmem:[%s1019_s1 + $0x38] sm:$0x7] }
  0xec   : > { %755 = vpow2.f32 %v685_v55  ;;  %v527_v0 = vadd.f32 %v519_v56, %v892_v50 }
  0xf2   : > { %v742_v62 = vpop.eup %741 }
  0xf3   : > { %v744_v63 = vpop.eup %743  ;;  %v492_v1 = vadd.f32 1.0, %v742_v62  ;;  %v530_v62 = vadd.f32 %v522_v52, %v883_v40 }
  0xf4   : > { %v496_v3 = vadd.f32 1.0, %v744_v63  ;;  %v746_v5 = vpop.eup %745 }
  0xf5   : > { %757 = vrcp.f32 %v492_v1  ;;  %v748_v7 = vpop.eup %747  ;;  %v493_v8 = vadd.f32 1.0, %v746_v5 }
  0xf6   : > { %759 = vrcp.f32 %v496_v3  ;;  %v750_v9 = vpop.eup %749  ;;  %v497_v10 = vadd.f32 1.0, %v748_v7  ;;  %v531_v3 = vadd.f32 %v523_v36, %v894_v51 }
  0xf7   : > { %v752_v11 = vpop.eup %751  ;;  %761 = vrcp.f32 %v493_v8  ;;  %v494_v13 = vadd.f32 1.0, %v750_v9 }
  0xf8   : > { %v754_v14 = vpop.eup %753  ;;  %763 = vrcp.f32 %v497_v10  ;;  %v498_v17 = vadd.f32 1.0, %v752_v11 }
  0xf9   : > { %v756_v18 = vpop.eup %755  ;;  %765 = vrcp.f32 %v494_v13  ;;  %v495_v21 = vadd.f32 1.0, %v754_v14 }
  0xfa   : > { %767 = vrcp.f32 %v498_v17  ;;  %v499_v25 = vadd.f32 1.0, %v756_v18 }
  0xfb   : > { %769 = vrcp.f32 %v495_v21 }
  0xfc   : > { %771 = vrcp.f32 %v499_v25 }
 0x102   : > { %v758_v42 = vpop.eup %757 }
 0x103   : > { %v760_v22 = vpop.eup %759  ;;  %v540_v46 = vsel %vm930_vm13, %v758_v42, %v524_v37 }
 0x104   : > { %548 = vst [vmem:[%s941_s19] sm:$0xff] %v540_v46  ;;  %v544_v23 = vsel %vm944_vm15, %v760_v22, %v528_v43  ;;  %v762_v53 = vpop.eup %761 }
 0x105   : > { %552 = vst [vmem:[%s941_s19 + $0x20] sm:$0xff] %v544_v23  ;;  %v764_v57 = vpop.eup %763  ;;  %v541_v35 = vsel %vm930_vm13, %v762_v53, %v525_v49 }
 0x106   : > { %v766_v60 = vpop.eup %765  ;;  %549 = vst [vmem:[%s941_s19 + $0x8] sm:$0xff] %v541_v35  ;;  %v545_v61 = vsel %vm944_vm15, %v764_v57, %v529_v54 }
 0x107   : > { %v768_v63 = vpop.eup %767  ;;  %553 = vst [vmem:[%s941_s19 + $0x28] sm:$0xff] %v545_v61  ;;  %v542_v39 = vsel %vm973_vm0, %v766_v60, %v526_v58 }
 0x108   : > { %v770_v1 = vpop.eup %769  ;;  %550 = vst [vmem:[%s941_s19 + $0x10] sm:$0xff] %v542_v39  ;;  %v546_v2 = vsel %vm983_vm1, %v768_v63, %v530_v62 }
 0x109   : > { %v772_v4 = vpop.eup %771  ;;  %554 = vst [vmem:[%s941_s19 + $0x30] sm:$0x7] %v546_v2  ;;  %v543_v5 = vsel %vm973_vm0, %v770_v1, %v527_v0 }
 0x10a   : > { %551 = vst [vmem:[%s941_s19 + $0x18] sm:$0xff] %v543_v5  ;;  %v547_v40 = vsel %vm983_vm1, %v772_v4, %v531_v3 }
 0x10b   : > { %555 = vst [vmem:[%s941_s19 + $0x38] sm:$0x7] %v547_v40 }
 0x10c PF: > { %s14_s17 = sadd.s32 1, %s795_s17   ;;  %s1039_s15 = smov %s791_s16 }
 0x10d   : > { %p11_p5 = scmp.ge.s32.totalorder %s14_s17, 4   ;;  %s1040_s16 = smov %s1042_s18 }
 0x10f   :  { %13 = sbr.rel (!%p11_p5) target bundleno = 2 (0x2), region = 69 }

</bundles_post_ra>
